<compile_context>
chip_gen: v5e
topology: v5e:2x2
jax: 0.10.0
libtpu: 0.0.40
codegen_flags: <defaults>
</compile_context>

<pallas_src>
import jax
import jax.numpy as jnp
from jax.experimental import pallas as pl
from jax.experimental.pallas import tpu as pltpu


# ----------------------------------------------------------------------------
# Tiny Pallas kernel: the 4 stacked (Linear -> ReLU -> Linear) heads of one
# FusionBlock ([gamma1, beta1, gamma2, beta2]), fused into two matmuls.
# ----------------------------------------------------------------------------
def _affine_mlp_kernel(y_ref, w1_ref, b1_ref, w2_ref, b2_ref, out_ref):
    y = y_ref[...]                                          # (B, c_dim) f32
    h = jnp.dot(y, w1_ref[...], preferred_element_type=jnp.float32) + b1_ref[...]
    h = jnp.maximum(h, 0.0)                                 # (B, 4C)
    out_ref[...] = jnp.dot(h, w2_ref[...],
                           preferred_element_type=jnp.float32) + b2_ref[...]


def _affine_mlps(y, w1, b1, w2, b2):
    """w1: (4, c_dim, C), b1: (4, 1, C), w2: (4, C, C), b2: (4, 1, C).
    Returns (B, 4, C), rows ordered [gamma1, beta1, gamma2, beta2]."""
    n, c_dim, C = w1.shape
    B = y.shape[0]
    # Fuse the four heads: first layer becomes one (c_dim, 4C) matmul, second
    # layer one block-diagonal (4C, 4C) matmul -> single lane-dense output.
    w1f = jnp.transpose(w1, (1, 0, 2)).reshape(c_dim, n * C)
    b1f = b1.reshape(1, n * C)
    w2f = jnp.zeros((n * C, n * C), jnp.float32)
    for i in range(n):
        w2f = w2f.at[i * C:(i + 1) * C, i * C:(i + 1) * C].set(w2[i])
    b2f = b2.reshape(1, n * C)
    out = pl.pallas_call(
        _affine_mlp_kernel,
        out_shape=jax.ShapeDtypeStruct((B, n * C), jnp.float32),
    )(y, w1f, b1f, w2f, b2f)
    return out.reshape(B, n, C)


# ----------------------------------------------------------------------------
# Main spatial kernel: fuse1 -> conv1 -> fuse2 -> conv2 (+ residual).
# One grid step == one batch element.  All spatial work happens on the
# flattened (H*W, C) layout (rows = pixels on sublanes, channels on lanes).
# ----------------------------------------------------------------------------
def _make_gblock_kernel(upsample, has_shortcut, W):
    def kernel(*refs):
        if has_shortcut:
            (x_ref, gb1_ref, gb2_ref, c1w_ref, c1b_ref, c2w_ref, c2b_ref,
             scw_ref, scb_ref, out_ref) = refs
        else:
            (x_ref, gb1_ref, gb2_ref, c1w_ref, c1b_ref, c2w_ref, c2b_ref,
             out_ref) = refs
            scw_ref = scb_ref = None

        HW, Cout = out_ref.shape                            # (H*W, Cout)
        H_in, _, Cin = x_ref.shape
        mm_dtype = c1w_ref.dtype                            # bf16 (or f32)

        # ---- load x; finish the nearest-neighbour 2x upsample (H direction:
        #      major-dim broadcast in VMEM -> halves x HBM traffic) ----
        x = x_ref[...]                                      # (H_in, W, Cin) f32
        if upsample:
            x = jnp.broadcast_to(x[:, None, :, :], (H_in, 2, W, Cin))
            x = x.reshape(2 * H_in, W, Cin)
        x2 = x.reshape(HW, Cin)                             # rows=pixels, lanes=chan

        # Keep the *smaller* residual operand live across the conv chain:
        # bf16 x for the 1x1-shortcut case, exact f32 x for identity residual.
        x_res = x2.astype(mm_dtype) if has_shortcut else x2

        # Column-boundary masks for the SAME-padding column shifts.
        col = jax.lax.broadcasted_iota(jnp.int32, (HW, 1), 0) % W
        not_first_col = col != 0
        not_last_col = col != (W - 1)

        def leaky(v):
            return jnp.where(v > 0, v, 0.2 * v)

        def fuse(h, gb_ref):
            # gb_ref: (4, C) = [gamma1, beta1, gamma2, beta2] for this image.
            h = leaky(gb_ref[0:1, :] * h + gb_ref[1:2, :])
            h = leaky(gb_ref[2:3, :] * h + gb_ref[3:4, :])
            return h
        # NOTE: elementwise math stays f32 (v5e has no bf16 VPU).  On v6e/v7x
        # this chain could be kept in bf16 to halve vreg/VMEM pressure.

        def conv3x3(h, cin, w_ref, b_ref, acc0=None):
            # 3x3 SAME conv as 3 matmuls grouped by column offset dj (K=3*cin):
            #   p_dj[i, j] = sum_di h[i+di-1, j] @ w[di, dj]
            #   out[i, j]  = sum_dj p_dj[i, j+dj-1]
            # Row shifts (di) are sublane-aligned copies on the flat layout
            # (offset = W rows); column shifts (dj) are applied to the small
            # (HW, Cout) products and masked at the image border.
            hq = h.astype(mm_dtype)                         # taps built in bf16
            zr = jnp.zeros((W, cin), mm_dtype)
            lhs = jnp.concatenate(
                [jnp.concatenate([zr, hq[:HW - W]], axis=0),   # h[i-1, j]
                 hq,                                            # h[i,   j]
                 jnp.concatenate([hq[W:], zr], axis=0)],        # h[i+1, j]
                axis=-1)                                        # (HW, 3*cin)

            # dj == 1: no column shift.  Residual/extra term folds in here.
            acc = jnp.dot(lhs, w_ref[1], preferred_element_type=jnp.float32)
            if acc0 is not None:
                acc = acc + acc0
            zc = jnp.zeros((1, Cout), jnp.float32)
            # dj == 0: out[i, j] += p0[i, j-1]
            p0 = jnp.dot(lhs, w_ref[0], preferred_element_type=jnp.float32)
            acc = acc + jnp.where(not_first_col,
                                  jnp.concatenate([zc, p0[:HW - 1]], axis=0), 0.0)
            # dj == 2: out[i, j] += p2[i, j+1]
            p2 = jnp.dot(lhs, w_ref[2], preferred_element_type=jnp.float32)
            acc = acc + jnp.where(not_last_col,
                                  jnp.concatenate([p2[1:], zc], axis=0), 0.0)
            return acc + b_ref[...]

        h = fuse(x2, gb1_ref)                               # fuse1 (Cin channels)
        h = conv3x3(h, Cin, c1w_ref, c1b_ref)               # conv1
        h = fuse(h, gb2_ref)                                # fuse2 (Cout channels)

        # Residual folded into conv2's accumulator (no separate full-size add).
        if has_shortcut:
            res = jnp.dot(x_res, scw_ref[...],
                          preferred_element_type=jnp.float32) + scb_ref[...]
        else:
            res = x_res
        h = conv3x3(h, Cout, c2w_ref, c2b_ref, acc0=res)    # conv2 + residual

        out_ref[...] = h.astype(out_ref.dtype)              # lane-dense store

    return kernel


def _pick_vmem_limit(wanted_bytes):
    """Scoped-VMEM budget from the actual working set and the chip's capacity
    (<= ~96 MiB on v5e/v6e's 128 MiB, <= ~48 MiB on v7x's 64 MiB)."""
    try:
        cap = int(pltpu.get_tpu_info().vmem_capacity_bytes)
    except Exception:
        cap = 128 * 1024 * 1024
    hard_cap = int(cap * 0.75)
    return int(min(max(int(wanted_bytes) + (8 << 20), 32 << 20), hard_cap))


# ----------------------------------------------------------------------------
# Wrapper: NHWC in, NHWC out (convert NCHW<->NHWC only at the model boundary).
# ----------------------------------------------------------------------------
def gblock_forward(x_nhwc, y, params, upsample=True, matmul_dtype=jnp.bfloat16):
    """Pallas GBlock forward.  x_nhwc: [B, H0, W0, Cin], y: [B, c_dim]."""
    x = x_nhwc.astype(jnp.float32)
    B, H0, W0, Cin = x.shape
    if upsample:
        # W-direction duplication in the wrapper, H-direction in the kernel.
        # TODO(synk): move the W interleave in-kernel too (sublane interleave).
        x = jnp.repeat(x, 2, axis=2)
        H, W = 2 * H0, 2 * W0
    else:
        H, W = H0, W0
    H_in = x.shape[1]
    Cout = params["c1w"].shape[-1]
    has_shortcut = Cin != Cout

    # gamma/beta heads (fused tiny matmuls) in a dedicated small Pallas call.
    y32 = y.astype(jnp.float32)
    gb1 = _affine_mlps(y32, params["f1w1"], params["f1b1"],
                       params["f1w2"], params["f1b2"])       # (B, 4, Cin)
    gb2 = _affine_mlps(y32, params["f2w1"], params["f2b1"],
                       params["f2w2"], params["f2b2"])       # (B, 4, Cout)

    # Conv weights regrouped by column offset dj: (3, 3*C, Cout), rows (di, c).
    c1w = jnp.transpose(params["c1w"], (1, 0, 2, 3)).reshape(3, 3 * Cin, Cout)
    c2w = jnp.transpose(params["c2w"], (1, 0, 2, 3)).reshape(3, 3 * Cout, Cout)
    c1w = c1w.astype(matmul_dtype)
    c2w = c2w.astype(matmul_dtype)
    c1b = params["c1b"].astype(jnp.float32)
    c2b = params["c2b"].astype(jnp.float32)

    args = [x, gb1, gb2, c1w, c1b, c2w, c2b]
    in_specs = [
        pl.BlockSpec((None, H_in, W, Cin), lambda b: (b, 0, 0, 0)),
        pl.BlockSpec((None, 4, Cin), lambda b: (b, 0, 0)),
        pl.BlockSpec((None, 4, Cout), lambda b: (b, 0, 0)),
        pl.BlockSpec((3, 3 * Cin, Cout), lambda b: (0, 0, 0)),
        pl.BlockSpec((1, Cout), lambda b: (0, 0)),
        pl.BlockSpec((3, 3 * Cout, Cout), lambda b: (0, 0, 0)),
        pl.BlockSpec((1, Cout), lambda b: (0, 0)),
    ]
    if has_shortcut:
        args += [params["scw"].astype(matmul_dtype),
                 params["scb"].astype(jnp.float32)]
        in_specs += [pl.BlockSpec((Cin, Cout), lambda b: (0, 0)),
                     pl.BlockSpec((1, Cout), lambda b: (0, 0))]

    flops = 2 * B * H * W * (9 * Cin * Cout + 9 * Cout * Cout
                             + (Cin * Cout if has_shortcut else 0))
    bytes_accessed = (B * H * W * Cout * 4
                      + sum(int(a.size) * a.dtype.itemsize for a in args))

    # Per-grid-step VMEM: blocks (double-buffered by the pipeline) + scratch.
    mm_bytes = jnp.dtype(matmul_dtype).itemsize
    cmax = max(Cin, Cout)
    block_bytes = (H_in * W * Cin * 4 + H * W * Cout * 4 + 16 * (Cin + Cout)
                   + (9 * Cin + 9 * Cout + Cin + 3) * Cout * mm_bytes)
    work_bytes = H * W * (6 * Cin               # x_up f32 + bf16 residual copy
                          + 4 * cmax            # fused activation h
                          + 3 * cmax * mm_bytes  # grouped conv LHS (bf16)
                          + 12 * Cout)          # product / shifted / accumulator
    vmem_limit = _pick_vmem_limit(2 * block_bytes + work_bytes)

    out = pl.pallas_call(
        _make_gblock_kernel(upsample, has_shortcut, W),
        out_shape=jax.ShapeDtypeStruct((B, H * W, Cout), jnp.float32),
        grid=(B,),
        in_specs=in_specs,
        out_specs=pl.BlockSpec((None, H * W, Cout), lambda b: (b, 0, 0)),
        compiler_params=pltpu.CompilerParams(
            dimension_semantics=("parallel",),
            vmem_limit_bytes=vmem_limit,
        ),
        cost_estimate=pl.CostEstimate(flops=int(flops), transcendentals=0,
                                      bytes_accessed=int(bytes_accessed)),
    )(*args)
    return out.reshape(B, H, W, Cout)           # contiguous (free) reshape, NHWC


# ----------------------------------------------------------------------------
# Plain-JAX reference (same math, XLA conv) for the correctness check.
# ----------------------------------------------------------------------------
def gblock_reference(x_nchw, y, params, upsample=True):
    x = jnp.transpose(x_nchw, (0, 2, 3, 1)).astype(jnp.float32)
    if upsample:
        x = jnp.repeat(jnp.repeat(x, 2, axis=1), 2, axis=2)

    def mlp(w1, b1, w2, b2):
        h = jnp.maximum(y.astype(jnp.float32) @ w1 + b1, 0.0)
        return h @ w2 + b2

    def fusion(h, w1, b1, w2, b2):
        g1, be1 = mlp(w1[0], b1[0], w2[0], b2[0]), mlp(w1[1], b1[1], w2[1], b2[1])
        g2, be2 = mlp(w1[2], b1[2], w2[2], b2[2]), mlp(w1[3], b1[3], w2[3], b2[3])
        h = g1[:, None, None, :] * h + be1[:, None, None, :]
        h = jnp.where(h > 0, h, 0.2 * h)
        h = g2[:, None, None, :] * h + be2[:, None, None, :]
        h = jnp.where(h > 0, h, 0.2 * h)
        return h

    def conv(h, w, b):
        o = jax.lax.conv_general_dilated(
            h, w, (1, 1), "SAME",
            dimension_numbers=("NHWC", "HWIO", "NHWC"),
            precision=jax.lax.Precision.HIGHEST)
        return o + b.reshape(1, 1, 1, -1)

    h = fusion(x, params["f1w1"], params["f1b1"], params["f1w2"], params["f1b2"])
    h = conv(h, params["c1w"], params["c1b"])
    h = fusion(h, params["f2w1"], params["f2b1"], params["f2w2"], params["f2b2"])
    h = conv(h, params["c2w"], params["c2b"])
    Cin, Cout = params["c1w"].shape[2], params["c1w"].shape[3]
    if Cin != Cout:
        sc = jnp.einsum("bhwi,io->bhwo", x, params["scw"],
                        precision=jax.lax.Precision.HIGHEST)
        sc = sc + params["scb"].reshape(1, 1, 1, -1)
    else:
        sc = x
    return jnp.transpose(h + sc, (0, 3, 1, 2))


def make_params(key, Cin, Cout, c_dim):
    """Deterministic synthetic init (shapes follow GBlock.__init__).

    Affine heads are stacked as [gamma1, beta1, gamma2, beta2]; conv weights
    are HWIO (PyTorch OIHW -> permute(2, 3, 1, 0)); shortcut 1x1 is [Cin, Cout]."""
    ks = iter(jax.random.split(key, 14))

    def rnd(shape, scale=0.2):
        return jax.random.normal(next(ks), shape, dtype=jnp.float32) * scale

    return dict(
        f1w1=rnd((4, c_dim, Cin)), f1b1=rnd((4, 1, Cin)),
        f1w2=rnd((4, Cin, Cin)), f1b2=rnd((4, 1, Cin)),
        f2w1=rnd((4, c_dim, Cout)), f2b1=rnd((4, 1, Cout)),
        f2w2=rnd((4, Cout, Cout)), f2b2=rnd((4, 1, Cout)),
        c1w=rnd((3, 3, Cin, Cout)), c1b=rnd((1, Cout)),
        c2w=rnd((3, 3, Cout, Cout)), c2b=rnd((1, Cout)),
        scw=rnd((Cin, Cout)), scb=rnd((1, Cout)),
    )


if __name__ == "__main__":
    # GBlock(in_channels=4, out_channels=8, c_dim=16, upsample=True), 8x8 -> 16x16
    B, Cin, Cout, c_dim, H0 = 2, 4, 8, 16, 8

    key = jax.random.PRNGKey(0)
    kx, ky, kp = jax.random.split(key, 3)
    x_nchw = jax.random.normal(kx, (B, Cin, H0, H0), dtype=jnp.float32)
    y = jax.random.normal(ky, (B, c_dim), dtype=jnp.float32)
    params = make_params(kp, Cin, Cout, c_dim)

    # NCHW -> NHWC once at the model boundary; GBlocks stay NHWC end-to-end.
    x_nhwc = jnp.transpose(x_nchw, (0, 2, 3, 1))

    # Performant (bf16 MXU) path.
    out_bf16 = jax.block_until_ready(gblock_forward(x_nhwc, y, params, upsample=True))
    assert out_bf16.shape == (B, 2 * H0, 2 * H0, Cout)

    # Same kernel with f32 matmuls (tight structural check).
    out_f32 = jax.block_until_ready(
        gblock_forward(x_nhwc, y, params, upsample=True, matmul_dtype=jnp.float32))

    with jax.default_matmul_precision("highest"):
        ref = jax.block_until_ready(gblock_reference(x_nchw, y, params, upsample=True))
    ref_nhwc = jnp.transpose(ref, (0, 2, 3, 1))

    if not jnp.allclose(out_f32, ref_nhwc, atol=1e-2, rtol=1e-2):
        raise ValueError("Pallas GBlock (f32 matmul) mismatch, max abs err = "
                         f"{float(jnp.max(jnp.abs(out_f32 - ref_nhwc)))}")
    if not jnp.allclose(out_bf16, ref_nhwc, atol=6e-2, rtol=6e-2):
        raise ValueError("Pallas GBlock (bf16 matmul) mismatch, max abs err = "
                         f"{float(jnp.max(jnp.abs(out_bf16 - ref_nhwc)))}")

    print("KERNEL_OK")
</pallas_src>

<mosaic_0001>
module attributes {stable_mosaic.version = 11 : i64} {
  func.func @_affine_mlp_kernel(%arg0: memref<2x16xf32, #tpu.memory_space<vmem>>, %arg1: memref<16x16xf32, #tpu.memory_space<vmem>>, %arg2: memref<1x16xf32, #tpu.memory_space<vmem>>, %arg3: memref<16x16xf32, #tpu.memory_space<vmem>>, %arg4: memref<1x16xf32, #tpu.memory_space<vmem>>, %arg5: memref<2x16xf32, #tpu.memory_space<vmem>>) attributes {dimension_semantics = [], scalar_prefetch = 0 : i64, scratch_operands = 0 : i64, tpu.core_type = #tpu.core_type<tc>} {
    %c0 = arith.constant 0 : index
    %c0_0 = arith.constant 0 : index
    %0 = vector.load %arg0[%c0, %c0_0] : memref<2x16xf32, #tpu.memory_space<vmem>>, vector<2x16xf32>
    %c0_1 = arith.constant 0 : index
    %c0_2 = arith.constant 0 : index
    %1 = vector.load %arg1[%c0_1, %c0_2] : memref<16x16xf32, #tpu.memory_space<vmem>>, vector<16x16xf32>
    %cst = arith.constant dense<0.000000e+00> : vector<2x16xf32>
    %2 = tpu.matmul %0, %1, %cst {dimension_numbers = #tpu.dot_dimension_numbers<[1], [0], [0], [1], [0, 0, 1, 1], [], []>} : vector<2x16xf32>, vector<16x16xf32>, vector<2x16xf32> -> vector<2x16xf32>
    %c0_3 = arith.constant 0 : index
    %c0_4 = arith.constant 0 : index
    %3 = vector.load %arg2[%c0_3, %c0_4] : memref<1x16xf32, #tpu.memory_space<vmem>>, vector<1x16xf32>
    %4 = vector.broadcast %3 : vector<1x16xf32> to vector<2x16xf32>
    %5 = arith.addf %2, %4 : vector<2x16xf32>
    %cst_5 = arith.constant 0.000000e+00 : f32
    %6 = vector.broadcast %cst_5 : f32 to vector<2x16xf32>
    %7 = arith.maximumf %5, %6 : vector<2x16xf32>
    %c0_6 = arith.constant 0 : index
    %c0_7 = arith.constant 0 : index
    %8 = vector.load %arg3[%c0_6, %c0_7] : memref<16x16xf32, #tpu.memory_space<vmem>>, vector<16x16xf32>
    %cst_8 = arith.constant dense<0.000000e+00> : vector<2x16xf32>
    %9 = tpu.matmul %7, %8, %cst_8 {dimension_numbers = #tpu.dot_dimension_numbers<[1], [0], [0], [1], [0, 0, 1, 1], [], []>} : vector<2x16xf32>, vector<16x16xf32>, vector<2x16xf32> -> vector<2x16xf32>
    %c0_9 = arith.constant 0 : index
    %c0_10 = arith.constant 0 : index
    %10 = vector.load %arg4[%c0_9, %c0_10] : memref<1x16xf32, #tpu.memory_space<vmem>>, vector<1x16xf32>
    %11 = vector.broadcast %10 : vector<1x16xf32> to vector<2x16xf32>
    %12 = arith.addf %9, %11 : vector<2x16xf32>
    %c0_11 = arith.constant 0 : index
    %c0_12 = arith.constant 0 : index
    %13 = vector.load %arg5[%c0_11, %c0_12] : memref<2x16xf32, #tpu.memory_space<vmem>>, vector<2x16xf32>
    tpu.vector_store %arg5[%c0_11, %c0_12], %12 {strides = array<i32>} : memref<2x16xf32, #tpu.memory_space<vmem>>, vector<2x16xf32>,
    return
  }
}

</mosaic_0001>

<bundles_post_ra>
// kernel: tpu_custom_call.1
= control target key start
LH: loop header
LB: loop body
LE: loop exit
PB: predicated region body
PF: predicated region fallthrough
CT: control target
= control target key end

     0   :  { %10 = vsyncpa [#allocation3], 0  ;;  %s313_s0 = inlined_call_operand.hbm [shape: f32[2,16], index: 0, kind: input, shape index: {}]   ;;  %s314_s1 = inlined_call_operand.hbm [shape: f32[16,16], index: 1, kind: input, shape index: {}]   ;;  %s315_s2 = inlined_call_operand.vmem [shape: f32[1,16], index: 2, kind: input, shape index: {}]   ;;  %s316_s3 = inlined_call_operand.hbm [shape: f32[16,16], index: 3, kind: input, shape index: {}]   ;;  %s317_s4 = inlined_call_operand.vmem [shape: f32[1,16], index: 4, kind: input, shape index: {}]   ;;  %s318_s5 = inlined_call_operand.hbm [shape: f32[2,16], index: 5, kind: output, shape index: {}]  }
   0x1   :  { %11 = vsyncpa [#allocation6], 0  ;;  %s28_s20 = sshll.u32 %s314_s1, 4  ;;  %s29_s20 = int_to_ptr.hbm [resolvable:$true] %s28_s20 }
   0x2   :  { %12 = vsyncpa [#allocation4], 0  ;;  %s259_s21 = smov [#allocation5]   ;;  %s18_s25 = sshll.u32 %s313_s0, 4  ;;  %s19_s25 = int_to_ptr.hbm [resolvable:$true] %s18_s25 }
   0x3   :  { %s30_s22 = sshll.u32 %s259_s21, 4  ;;  %s260_s26 = smov 128   ;;  %s31_s22 = int_to_ptr.vmem [resolvable:$true] %s30_s22 }
   0x4   :  { %s261_s27 = smov 8   ;;  %s262_s28 = smov [#allocation2]  }
   0x5   :  { %36 = dma.hbm_to_vmem [thread:$0]  %s29_s20, 256, %s31_s22, [#allocation6], %s260_s26, %s260_s26, %s261_s27  }
   0x6   :  { %s20_s29 = sshll.u32 %s262_s28, 4  ;;  %s43_s7 = sshll.u32 %s316_s3, 4  ;;  %s21_s29 = int_to_ptr.vmem [resolvable:$true] %s20_s29  ;;  %s44_s7 = int_to_ptr.hbm [resolvable:$true] %s43_s7 }
   0x7   :  { %23 = dma.hbm_to_vmem [thread:$0]  %s19_s25, 32, %s21_s29, [#allocation3]  }
   0x8   :  { %s263_s1 = smov [#allocation7]  }
   0x9   :  { %s45_s8 = sshll.u32 %s263_s1, 4  ;;  %s46_s8 = int_to_ptr.vmem [resolvable:$true] %s45_s8 }
   0xa   :  { %51 = dma.hbm_to_vmem [thread:$0]  %s44_s7, 256, %s46_s8, [#allocation6], %s260_s26, %s260_s26, %s261_s27  }
   0xb   :  { %253 = dma.done.wait [#allocation3], 32  }
   0xc   :  { %254 = vsyncadd [#allocation3], 4294967264 }
   0xd   :  { %255 = dma.done.wait [#allocation6], 512  }
   0xe   :  { %256 = vsyncadd [#allocation6], 4294966784  ;;  %v68_v0 = vld [vmem:[#allocation5 + $0x8] sm:$0xff]  ;;  %v67_v1 = vld [vmem:[#allocation5] sm:$0xff]  ;;  %vm73_vm0 = vcmask 130048   ;;  %s264_s11 = smov [#allocation8]  }
   0xf   :  { %91 = vmatpush.msra.mxu0 %v68_v0  ;;  %v66_v2 = vld [vmem:[#allocation2] sm:$0x3]  ;;  %v98_v4 = vld [vmem:[#allocation7] sm:$0xff]  ;;  %s134_s12 = sshll.u32 %s264_s11, 4  ;;  %s136_s15 = sshll.u32 %s318_s5, 4  ;;  %vm127_vm1 = vcmask 123904   ;;  %s135_s12 = int_to_ptr.vmem [resolvable:$true] %s134_s12  ;;  %s137_s15 = int_to_ptr.hbm [resolvable:$true] %s136_s15 }
  0x10   :  { %v99_v3 = vld [vmem:[#allocation7 + $0x8] sm:$0xff] }
  0x11   :  { %92 = vmatpush.msra.mxu0 %v67_v1  ;;  %121 = vmatpush.msra.mxu1 %v99_v3  ;;  %v155_v5 = vld [vmem:[%s315_s2] ss:$0 sm:$0xff] }
  0x12   :  { %147 = vmatmul.msk.f32.vlgmr.msra.gmra.mxu0 %vm73_vm0, %v66_v2  ;;  %v156_v9 = vld [vmem:[%s317_s4] ss:$0 sm:$0xff] }
  0x13   :  { %122 = vmatpush.msra.mxu1 %v98_v4 }
  0x8f   :  { %v94_v6 = vpop.f32.mrf.mxu0 }
  0x90   :  { %v95_v7 = vadd.f32 %v155_v5, %v94_v6 }
  0x92   :  { %v97_v8 = vmax.f32 %v95_v7, 0.0 }
  0x94   :  { %148 = vmatmul.msk.f32.vlgmr.msra.gmra.mxu1 %vm73_vm0, %v97_v8 }
 0x111   :  { %v124_v10 = vpop.f32.mrf.mxu1 }
 0x112   :  { %v125_v11 = vadd.f32 %v156_v9, %v124_v10 }
 0x114   :  { %128 = vst.msk [vmem:[#allocation8] sm:$0x3] %vm127_vm1, %v125_v11 }
 0x115   :  { %139 = dma.vmem_to_hbm [thread:$0]  %s135_s12, 32, %s137_s15, [#allocation4]  }
 0x116   :  { %257 = dma.done.wait [#allocation4], 32  }
 0x117   :  { %258 = vsyncadd [#allocation4], 4294967264 }
 0x118   :  { %144 = vsyncpa [#allocation3], 1 }
 0x119   :  { %145 = vsyncpa [#allocation6], 1 }
 0x11a   :  { %146 = vsyncpa [#allocation4], 1 }

</bundles_post_ra>
